<compile_context>
chip_gen: v6e
topology: v6e:2x2x1
jax: 0.10.0
libtpu: 0.0.40
codegen_flags: <defaults>
</compile_context>

<pallas_src>
import functools

import jax
import jax.numpy as jnp
from jax import lax
from jax.experimental import pallas as pl
from jax.experimental.pallas import tpu as pltpu


def _round_up(x, m):
    return ((x + m - 1) // m) * m


# ----------------------------------------------------------------------------
# Fused bottleneck kernel: one grid step == one batch image.
# Layout inside the kernel: activations are (C, H*W)  (channels on sublanes,
# flattened spatial on lanes).
# ----------------------------------------------------------------------------
def _bottleneck_kernel(x_ref, w1_ref, b1_ref, w2_ref, b2_ref, w3_ref, b3_ref,
                       o_ref, pbuf_ref, patch_ref, *, H, W):
    HW = H * W
    lpad = _round_up(W + 1, 128)                 # lane-aligned flat zero pad

    x = x_ref[0]                                 # (Cin, HW) -- also residual

    # ---- conv1 (1x1) + bn1 + relu  (BN scale pre-folded into w1) -----------
    h1 = jnp.dot(w1_ref[...], x, preferred_element_type=jnp.float32)
    h1 = jnp.maximum(h1 + b1_ref[...], 0.0)      # (P, HW)
    P = h1.shape[0]

    # ---- conv2 (3x3, stride 1, pad 1) + bn2 + relu --------------------------
    # Flat-spatial formulation: tap (ky,kx) of the padded image is the window
    # of the flat activation shifted by (ky-1)*W + (kx-1).  Vertical
    # out-of-range reads land in the zero pad; horizontal row wrap-around is
    # masked per kx.  The 9 taps are packed into a (9*P, HW) im2col buffer so
    # conv2 is a single K = 9*P matmul.
    pbuf_ref[...] = jnp.zeros_like(pbuf_ref)
    pbuf_ref[:, lpad:lpad + HW] = h1

    xcol = lax.broadcasted_iota(jnp.int32, (P, HW), 1) % W
    for ky in range(3):
        for kx in range(3):
            k = ky * 3 + kx
            start = lpad + (ky - 1) * W + (kx - 1)
            t = pbuf_ref[:, start:start + HW]
            if kx == 0:                          # x - 1 < 0 at left edge
                t = jnp.where(xcol >= 1, t, 0.0)
            elif kx == 2:                        # x + 1 >= W at right edge
                t = jnp.where(xcol <= W - 2, t, 0.0)
            patch_ref[k * P:(k + 1) * P, :] = t

    h2 = jnp.dot(w2_ref[...], patch_ref[...],
                 preferred_element_type=jnp.float32)      # (P, 9P)@(9P, HW)
    h2 = jnp.maximum(h2 + b2_ref[...], 0.0)

    # ---- conv3 (1x1) + bn3 + residual add + relu ----------------------------
    y = jnp.dot(w3_ref[...], h2, preferred_element_type=jnp.float32)
    o_ref[0] = jnp.maximum(y + b3_ref[...] + x, 0.0)


# ----------------------------------------------------------------------------
# Parameter construction (deterministic) and BN folding
# ----------------------------------------------------------------------------
def make_params(key, inplanes, planes, expansion=4):
    ks = jax.random.split(key, 12)
    outplanes = planes * expansion

    def bn(k, c):
        g = 1.0 + 0.1 * jax.random.normal(k, (c,), jnp.float32)
        kb, km, kv = jax.random.split(k, 3)
        b = 0.1 * jax.random.normal(kb, (c,), jnp.float32)
        m = 0.05 * jax.random.normal(km, (c,), jnp.float32)
        v = 1.0 + 0.1 * jax.random.uniform(kv, (c,), jnp.float32)
        return dict(gamma=g, beta=b, mean=m, var=v)

    return {
        # PyTorch OIHW weights
        "w1": 0.1 * jax.random.normal(ks[0], (planes, inplanes, 1, 1), jnp.float32),
        "w2": 0.1 * jax.random.normal(ks[1], (planes, planes, 3, 3), jnp.float32),
        "w3": 0.1 * jax.random.normal(ks[2], (outplanes, planes, 1, 1), jnp.float32),
        "bn1": bn(ks[3], planes),
        "bn2": bn(ks[4], planes),
        "bn3": bn(ks[5], outplanes),
    }


def _fold_bn(bn, eps=1e-5):
    scale = bn["gamma"] / jnp.sqrt(bn["var"] + eps)
    bias = bn["beta"] - bn["mean"] * scale
    return scale, bias                            # (C,), (C,)


# ----------------------------------------------------------------------------
# Bottleneck forward (single fused pallas_call) and pure-JAX reference
# ----------------------------------------------------------------------------
def bottleneck_pallas(x_nchw, params):
    N, Cin, H, W = x_nchw.shape
    HW = H * W
    x = x_nchw.reshape(N, Cin, HW).astype(jnp.float32)   # NCHW, flat spatial

    s1, b1 = _fold_bn(params["bn1"])
    s2, b2 = _fold_bn(params["bn2"])
    s3, b3 = _fold_bn(params["bn3"])

    P = params["w1"].shape[0]                     # planes
    # Fold BN scale into conv weights (one-time constant fold on tiny weights).
    w1m = params["w1"][:, :, 0, 0] * s1[:, None]                    # (P, Cin)
    w2s = params["w2"] * s2[:, None, None, None]                    # OIHW
    w2m = jnp.transpose(w2s, (0, 2, 3, 1)).reshape(P, 9 * P)        # (P, 9P)
    w3m = params["w3"][:, :, 0, 0] * s3[:, None]                    # (Cout, P)
    Cout = w3m.shape[0]
    assert Cout == Cin, "identity residual requires inplanes == planes * 4"

    b1m, b2m, b3m = b1[:, None], b2[:, None], b3[:, None]           # (C, 1)

    lpad = _round_up(W + 1, 128)
    kernel = functools.partial(_bottleneck_kernel, H=H, W=W)

    flops = 2 * N * HW * (P * Cin + P * 9 * P + Cout * P)
    bytes_accessed = 4 * (N * Cin * HW + N * Cout * HW
                          + P * Cin + P * 9 * P + Cout * P + 2 * P + Cout)

    out = pl.pallas_call(
        kernel,
        out_shape=jax.ShapeDtypeStruct((N, Cout, HW), jnp.float32),
        grid=(N,),
        in_specs=[
            pl.BlockSpec((1, Cin, HW), lambda n: (n, 0, 0)),   # x (per image)
            pl.BlockSpec((P, Cin), lambda n: (0, 0)),          # w1 (scaled)
            pl.BlockSpec((P, 1), lambda n: (0, 0)),            # b1
            pl.BlockSpec((P, 9 * P), lambda n: (0, 0)),        # w2 (im2col, scaled)
            pl.BlockSpec((P, 1), lambda n: (0, 0)),            # b2
            pl.BlockSpec((Cout, P), lambda n: (0, 0)),         # w3 (scaled)
            pl.BlockSpec((Cout, 1), lambda n: (0, 0)),         # b3
        ],
        out_specs=pl.BlockSpec((1, Cout, HW), lambda n: (n, 0, 0)),
        scratch_shapes=[
            pltpu.VMEM((P, HW + 2 * lpad), jnp.float32),       # padded flat h1
            pltpu.VMEM((9 * P, HW), jnp.float32),              # im2col patches
        ],
        compiler_params=pltpu.CompilerParams(
            dimension_semantics=("parallel",)),
        cost_estimate=pl.CostEstimate(flops=flops, transcendentals=0,
                                      bytes_accessed=bytes_accessed),
    )(x, w1m, b1m, w2m, b2m, w3m, b3m)

    return out.reshape(N, Cout, H, W)                          # NCHW


def bottleneck_reference(x_nchw, params, eps=1e-5):
    def bn_apply(y, bn):
        g = bn["gamma"][None, :, None, None]
        b = bn["beta"][None, :, None, None]
        m = bn["mean"][None, :, None, None]
        v = bn["var"][None, :, None, None]
        return (y - m) / jnp.sqrt(v + eps) * g + b

    dn = ("NCHW", "OIHW", "NCHW")
    x = x_nchw.astype(jnp.float32)
    out = lax.conv_general_dilated(x, params["w1"], (1, 1), "VALID",
                                   dimension_numbers=dn)
    out = jax.nn.relu(bn_apply(out, params["bn1"]))
    out = lax.conv_general_dilated(out, params["w2"], (1, 1), ((1, 1), (1, 1)),
                                   dimension_numbers=dn)
    out = jax.nn.relu(bn_apply(out, params["bn2"]))
    out = lax.conv_general_dilated(out, params["w3"], (1, 1), "VALID",
                                   dimension_numbers=dn)
    out = bn_apply(out, params["bn3"])
    return jax.nn.relu(out + x)


# ----------------------------------------------------------------------------
if __name__ == "__main__":
    key = jax.random.PRNGKey(0)
    k_x, k_p = jax.random.split(key)

    planes = 4
    expansion = 4
    inplanes = planes * expansion       # identity residual (downsample=None)
    N, H, W = 2, 16, 16

    x = jax.random.normal(k_x, (N, inplanes, H, W), jnp.float32)   # NCHW input
    params = make_params(k_p, inplanes, planes, expansion)

    out = jax.block_until_ready(bottleneck_pallas(x, params))
    ref = jax.block_until_ready(bottleneck_reference(x, params))

    assert out.shape == (N, planes * expansion, H, W), out.shape
    assert jnp.allclose(out, ref, atol=1e-4, rtol=1e-4), \
        float(jnp.max(jnp.abs(out - ref)))

    print("KERNEL_OK")
</pallas_src>

<mosaic_0001>
module attributes {stable_mosaic.version = 11 : i64} {
  func.func @_bottleneck_kernel(%arg0: i32, %arg1: memref<1x16x256xf32, #tpu.memory_space<vmem>>, %arg2: memref<4x16xf32, #tpu.memory_space<vmem>>, %arg3: memref<4x1xf32, #tpu.memory_space<vmem>>, %arg4: memref<4x36xf32, #tpu.memory_space<vmem>>, %arg5: memref<4x1xf32, #tpu.memory_space<vmem>>, %arg6: memref<16x4xf32, #tpu.memory_space<vmem>>, %arg7: memref<16x1xf32, #tpu.memory_space<vmem>>, %arg8: memref<1x16x256xf32, #tpu.memory_space<vmem>>, %arg9: memref<4x512xf32, #tpu.memory_space<vmem>>, %arg10: memref<36x256xf32, #tpu.memory_space<vmem>>) attributes {dimension_semantics = [#tpu.dimension_semantics<parallel>], iteration_bounds = array<i64: 2>, scalar_prefetch = 0 : i64, scratch_operands = 2 : i64, tpu.core_type = #tpu.core_type<tc>, window_params = [{transform_indices = @transform_0, window_bounds = array<i64: 1, 16, 256>}, {pipeline_mode = #tpu.pipeline_mode<synchronous>, transform_indices = @transform_1, window_bounds = array<i64: 4, 16>}, {pipeline_mode = #tpu.pipeline_mode<synchronous>, transform_indices = @transform_2, window_bounds = array<i64: 4, 1>}, {pipeline_mode = #tpu.pipeline_mode<synchronous>, transform_indices = @transform_3, window_bounds = array<i64: 4, 36>}, {pipeline_mode = #tpu.pipeline_mode<synchronous>, transform_indices = @transform_4, window_bounds = array<i64: 4, 1>}, {pipeline_mode = #tpu.pipeline_mode<synchronous>, transform_indices = @transform_5, window_bounds = array<i64: 16, 4>}, {pipeline_mode = #tpu.pipeline_mode<synchronous>, transform_indices = @transform_6, window_bounds = array<i64: 16, 1>}, {transform_indices = @transform_7, window_bounds = array<i64: 1, 16, 256>}]} {
    %c0 = arith.constant 0 : index
    %c0_0 = arith.constant 0 : index
    %c0_1 = arith.constant 0 : index
    %0 = vector.load %arg1[%c0, %c0_0, %c0_1] : memref<1x16x256xf32, #tpu.memory_space<vmem>>, vector<1x16x256xf32>
    %1 = vector.shape_cast %0 : vector<1x16x256xf32> to vector<16x256xf32>
    %c0_2 = arith.constant 0 : index
    %c0_3 = arith.constant 0 : index
    %2 = vector.load %arg2[%c0_2, %c0_3] : memref<4x16xf32, #tpu.memory_space<vmem>>, vector<4x16xf32>
    %cst = arith.constant dense<0.000000e+00> : vector<4x256xf32>
    %3 = tpu.matmul %2, %1, %cst {dimension_numbers = #tpu.dot_dimension_numbers<[1], [0], [0], [1], [0, 0, 1, 1], [], []>} : vector<4x16xf32>, vector<16x256xf32>, vector<4x256xf32> -> vector<4x256xf32>
    %c0_4 = arith.constant 0 : index
    %c0_5 = arith.constant 0 : index
    %4 = vector.load %arg3[%c0_4, %c0_5] : memref<4x1xf32, #tpu.memory_space<vmem>>, vector<4x1xf32>
    %5 = vector.broadcast %4 : vector<4x1xf32> to vector<4x256xf32>
    %6 = arith.addf %3, %5 : vector<4x256xf32>
    %cst_6 = arith.constant 0.000000e+00 : f32
    %7 = vector.broadcast %cst_6 : f32 to vector<4x256xf32>
    %8 = arith.maximumf %6, %7 : vector<4x256xf32>
    %cst_7 = arith.constant 0.000000e+00 : f32
    %9 = vector.broadcast %cst_7 : f32 to vector<4x512xf32>
    %c0_8 = arith.constant 0 : index
    %c0_9 = arith.constant 0 : index
    %10 = vector.load %arg9[%c0_8, %c0_9] : memref<4x512xf32, #tpu.memory_space<vmem>>, vector<4x512xf32>
    tpu.vector_store %arg9[%c0_8, %c0_9], %9 {strides = array<i32>} : memref<4x512xf32, #tpu.memory_space<vmem>>, vector<4x512xf32>,
    %c0_10 = arith.constant 0 : index
    %c128 = arith.constant 128 : index
    %11 = vector.load %arg9[%c0_10, %c128] : memref<4x512xf32, #tpu.memory_space<vmem>>, vector<4x256xf32>
    tpu.vector_store %arg9[%c0_10, %c128], %8 {strides = array<i32>} : memref<4x512xf32, #tpu.memory_space<vmem>>, vector<4x256xf32>,
    %12 = tpu.iota {dimensions = array<i32: 1>} : vector<4x256xi32>
    %c16_i32 = arith.constant 16 : i32
    %c0_i32 = arith.constant 0 : i32
    %13 = arith.cmpi eq, %c16_i32, %c0_i32 : i32
    %c1_i32 = arith.constant 1 : i32
    %14 = arith.select %13, %c1_i32, %c16_i32 : i32
    %15 = vector.broadcast %14 : i32 to vector<4x256xi32>
    %16 = arith.remsi %12, %15 : vector<4x256xi32>
    %c0_i32_11 = arith.constant 0 : i32
    %17 = vector.broadcast %c0_i32_11 : i32 to vector<4x256xi32>
    %18 = arith.cmpi ne, %16, %17 : vector<4x256xi32>
    %c0_i32_12 = arith.constant 0 : i32
    %19 = vector.broadcast %c0_i32_12 : i32 to vector<4x256xi32>
    %20 = arith.cmpi slt, %16, %19 : vector<4x256xi32>
    %c0_i32_13 = arith.constant 0 : i32
    %21 = arith.cmpi slt, %14, %c0_i32_13 : i32
    %22 = vector.broadcast %21 : i1 to vector<4x256xi1>
    %23 = vector.broadcast %22 : vector<4x256xi1> to vector<4x256xi1>
    %24 = arith.xori %20, %23 : vector<4x256xi1>
    %25 = arith.andi %24, %18 : vector<4x256xi1>
    %26 = vector.broadcast %14 : i32 to vector<4x256xi32>
    %27 = arith.addi %16, %26 : vector<4x256xi32>
    %28 = arith.select %25, %27, %16 : vector<4x256xi1>, vector<4x256xi32>
    %c0_14 = arith.constant 0 : index
    %c111 = arith.constant 111 : index
    %29 = vector.load %arg9[%c0_14, %c111] : memref<4x512xf32, #tpu.memory_space<vmem>>, vector<4x256xf32>
    %c1_i32_15 = arith.constant 1 : i32
    %30 = vector.broadcast %c1_i32_15 : i32 to vector<4x256xi32>
    %31 = arith.cmpi sge, %28, %30 : vector<4x256xi32>
    %cst_16 = arith.constant 0.000000e+00 : f32
    %32 = vector.broadcast %cst_16 : f32 to vector<4x256xf32>
    %33 = arith.select %31, %29, %32 : vector<4x256xi1>, vector<4x256xf32>
    %c0_17 = arith.constant 0 : index
    %c0_18 = arith.constant 0 : index
    %34 = vector.load %arg10[%c0_17, %c0_18] : memref<36x256xf32, #tpu.memory_space<vmem>>, vector<4x256xf32>
    tpu.vector_store %arg10[%c0_17, %c0_18], %33 {strides = array<i32>} : memref<36x256xf32, #tpu.memory_space<vmem>>, vector<4x256xf32>,
    %c0_19 = arith.constant 0 : index
    %c112 = arith.constant 112 : index
    %35 = vector.load %arg9[%c0_19, %c112] : memref<4x512xf32, #tpu.memory_space<vmem>>, vector<4x256xf32>
    %c4 = arith.constant 4 : index
    %c0_20 = arith.constant 0 : index
    %36 = vector.load %arg10[%c4, %c0_20] : memref<36x256xf32, #tpu.memory_space<vmem>>, vector<4x256xf32>
    tpu.vector_store %arg10[%c4, %c0_20], %35 {strides = array<i32>} : memref<36x256xf32, #tpu.memory_space<vmem>>, vector<4x256xf32>,
    %c0_21 = arith.constant 0 : index
    %c113 = arith.constant 113 : index
    %37 = vector.load %arg9[%c0_21, %c113] : memref<4x512xf32, #tpu.memory_space<vmem>>, vector<4x256xf32>
    %c14_i32 = arith.constant 14 : i32
    %38 = vector.broadcast %c14_i32 : i32 to vector<4x256xi32>
    %39 = arith.cmpi sle, %28, %38 : vector<4x256xi32>
    %cst_22 = arith.constant 0.000000e+00 : f32
    %40 = vector.broadcast %cst_22 : f32 to vector<4x256xf32>
    %41 = arith.select %39, %37, %40 : vector<4x256xi1>, vector<4x256xf32>
    %c8 = arith.constant 8 : index
    %c0_23 = arith.constant 0 : index
    %42 = vector.load %arg10[%c8, %c0_23] : memref<36x256xf32, #tpu.memory_space<vmem>>, vector<4x256xf32>
    tpu.vector_store %arg10[%c8, %c0_23], %41 {strides = array<i32>} : memref<36x256xf32, #tpu.memory_space<vmem>>, vector<4x256xf32>,
    %c0_24 = arith.constant 0 : index
    %c127 = arith.constant 127 : index
    %43 = vector.load %arg9[%c0_24, %c127] : memref<4x512xf32, #tpu.memory_space<vmem>>, vector<4x256xf32>
    %c1_i32_25 = arith.constant 1 : i32
    %44 = vector.broadcast %c1_i32_25 : i32 to vector<4x256xi32>
    %45 = arith.cmpi sge, %28, %44 : vector<4x256xi32>
    %cst_26 = arith.constant 0.000000e+00 : f32
    %46 = vector.broadcast %cst_26 : f32 to vector<4x256xf32>
    %47 = arith.select %45, %43, %46 : vector<4x256xi1>, vector<4x256xf32>
    %c12 = arith.constant 12 : index
    %c0_27 = arith.constant 0 : index
    %48 = vector.load %arg10[%c12, %c0_27] : memref<36x256xf32, #tpu.memory_space<vmem>>, vector<4x256xf32>
    tpu.vector_store %arg10[%c12, %c0_27], %47 {strides = array<i32>} : memref<36x256xf32, #tpu.memory_space<vmem>>, vector<4x256xf32>,
    %c0_28 = arith.constant 0 : index
    %c128_29 = arith.constant 128 : index
    %49 = vector.load %arg9[%c0_28, %c128_29] : memref<4x512xf32, #tpu.memory_space<vmem>>, vector<4x256xf32>
    %c16 = arith.constant 16 : index
    %c0_30 = arith.constant 0 : index
    %50 = vector.load %arg10[%c16, %c0_30] : memref<36x256xf32, #tpu.memory_space<vmem>>, vector<4x256xf32>
    tpu.vector_store %arg10[%c16, %c0_30], %49 {strides = array<i32>} : memref<36x256xf32, #tpu.memory_space<vmem>>, vector<4x256xf32>,
    %c0_31 = arith.constant 0 : index
    %c129 = arith.constant 129 : index
    %51 = vector.load %arg9[%c0_31, %c129] : memref<4x512xf32, #tpu.memory_space<vmem>>, vector<4x256xf32>
    %c14_i32_32 = arith.constant 14 : i32
    %52 = vector.broadcast %c14_i32_32 : i32 to vector<4x256xi32>
    %53 = arith.cmpi sle, %28, %52 : vector<4x256xi32>
    %cst_33 = arith.constant 0.000000e+00 : f32
    %54 = vector.broadcast %cst_33 : f32 to vector<4x256xf32>
    %55 = arith.select %53, %51, %54 : vector<4x256xi1>, vector<4x256xf32>
    %c20 = arith.constant 20 : index
    %c0_34 = arith.constant 0 : index
    %56 = vector.load %arg10[%c20, %c0_34] : memref<36x256xf32, #tpu.memory_space<vmem>>, vector<4x256xf32>
    tpu.vector_store %arg10[%c20, %c0_34], %55 {strides = array<i32>} : memref<36x256xf32, #tpu.memory_space<vmem>>, vector<4x256xf32>,
    %c0_35 = arith.constant 0 : index
    %c143 = arith.constant 143 : index
    %57 = vector.load %arg9[%c0_35, %c143] : memref<4x512xf32, #tpu.memory_space<vmem>>, vector<4x256xf32>
    %c1_i32_36 = arith.constant 1 : i32
    %58 = vector.broadcast %c1_i32_36 : i32 to vector<4x256xi32>
    %59 = arith.cmpi sge, %28, %58 : vector<4x256xi32>
    %cst_37 = arith.constant 0.000000e+00 : f32
    %60 = vector.broadcast %cst_37 : f32 to vector<4x256xf32>
    %61 = arith.select %59, %57, %60 : vector<4x256xi1>, vector<4x256xf32>
    %c24 = arith.constant 24 : index
    %c0_38 = arith.constant 0 : index
    %62 = vector.load %arg10[%c24, %c0_38] : memref<36x256xf32, #tpu.memory_space<vmem>>, vector<4x256xf32>
    tpu.vector_store %arg10[%c24, %c0_38], %61 {strides = array<i32>} : memref<36x256xf32, #tpu.memory_space<vmem>>, vector<4x256xf32>,
    %c0_39 = arith.constant 0 : index
    %c144 = arith.constant 144 : index
    %63 = vector.load %arg9[%c0_39, %c144] : memref<4x512xf32, #tpu.memory_space<vmem>>, vector<4x256xf32>
    %c28 = arith.constant 28 : index
    %c0_40 = arith.constant 0 : index
    %64 = vector.load %arg10[%c28, %c0_40] : memref<36x256xf32, #tpu.memory_space<vmem>>, vector<4x256xf32>
    tpu.vector_store %arg10[%c28, %c0_40], %63 {strides = array<i32>} : memref<36x256xf32, #tpu.memory_space<vmem>>, vector<4x256xf32>,
    %c0_41 = arith.constant 0 : index
    %c145 = arith.constant 145 : index
    %65 = vector.load %arg9[%c0_41, %c145] : memref<4x512xf32, #tpu.memory_space<vmem>>, vector<4x256xf32>
    %c14_i32_42 = arith.constant 14 : i32
    %66 = vector.broadcast %c14_i32_42 : i32 to vector<4x256xi32>
    %67 = arith.cmpi sle, %28, %66 : vector<4x256xi32>
    %cst_43 = arith.constant 0.000000e+00 : f32
    %68 = vector.broadcast %cst_43 : f32 to vector<4x256xf32>
    %69 = arith.select %67, %65, %68 : vector<4x256xi1>, vector<4x256xf32>
    %c32 = arith.constant 32 : index
    %c0_44 = arith.constant 0 : index
    %70 = vector.load %arg10[%c32, %c0_44] : memref<36x256xf32, #tpu.memory_space<vmem>>, vector<4x256xf32>
    tpu.vector_store %arg10[%c32, %c0_44], %69 {strides = array<i32>} : memref<36x256xf32, #tpu.memory_space<vmem>>, vector<4x256xf32>,
    %c0_45 = arith.constant 0 : index
    %c0_46 = arith.constant 0 : index
    %71 = vector.load %arg4[%c0_45, %c0_46] : memref<4x36xf32, #tpu.memory_space<vmem>>, vector<4x36xf32>
    %c0_47 = arith.constant 0 : index
    %c0_48 = arith.constant 0 : index
    %72 = vector.load %arg10[%c0_47, %c0_48] : memref<36x256xf32, #tpu.memory_space<vmem>>, vector<36x256xf32>
    %cst_49 = arith.constant dense<0.000000e+00> : vector<4x256xf32>
    %73 = tpu.matmul %71, %72, %cst_49 {dimension_numbers = #tpu.dot_dimension_numbers<[1], [0], [0], [1], [0, 0, 1, 1], [], []>} : vector<4x36xf32>, vector<36x256xf32>, vector<4x256xf32> -> vector<4x256xf32>
    %c0_50 = arith.constant 0 : index
    %c0_51 = arith.constant 0 : index
    %74 = vector.load %arg5[%c0_50, %c0_51] : memref<4x1xf32, #tpu.memory_space<vmem>>, vector<4x1xf32>
    %75 = vector.broadcast %74 : vector<4x1xf32> to vector<4x256xf32>
    %76 = arith.addf %73, %75 : vector<4x256xf32>
    %cst_52 = arith.constant 0.000000e+00 : f32
    %77 = vector.broadcast %cst_52 : f32 to vector<4x256xf32>
    %78 = arith.maximumf %76, %77 : vector<4x256xf32>
    %c0_53 = arith.constant 0 : index
    %c0_54 = arith.constant 0 : index
    %79 = vector.load %arg6[%c0_53, %c0_54] : memref<16x4xf32, #tpu.memory_space<vmem>>, vector<16x4xf32>
    %cst_55 = arith.constant dense<0.000000e+00> : vector<16x256xf32>
    %80 = tpu.matmul %79, %78, %cst_55 {dimension_numbers = #tpu.dot_dimension_numbers<[1], [0], [0], [1], [0, 0, 1, 1], [], []>} : vector<16x4xf32>, vector<4x256xf32>, vector<16x256xf32> -> vector<16x256xf32>
    %c0_56 = arith.constant 0 : index
    %c0_57 = arith.constant 0 : index
    %81 = vector.load %arg7[%c0_56, %c0_57] : memref<16x1xf32, #tpu.memory_space<vmem>>, vector<16x1xf32>
    %82 = vector.broadcast %81 : vector<16x1xf32> to vector<16x256xf32>
    %83 = arith.addf %80, %82 : vector<16x256xf32>
    %84 = arith.addf %83, %1 : vector<16x256xf32>
    %cst_58 = arith.constant 0.000000e+00 : f32
    %85 = vector.broadcast %cst_58 : f32 to vector<16x256xf32>
    %86 = arith.maximumf %84, %85 : vector<16x256xf32>
    %c0_59 = arith.constant 0 : index
    %c0_60 = arith.constant 0 : index
    %c0_61 = arith.constant 0 : index
    %87 = vector.load %arg8[%c0_59, %c0_60, %c0_61] : memref<1x16x256xf32, #tpu.memory_space<vmem>>, vector<1x16x256xf32>
    %88 = vector.shape_cast %87 : vector<1x16x256xf32> to vector<16x256xf32>
    %89 = vector.shape_cast %86 : vector<16x256xf32> to vector<1x16x256xf32>
    tpu.vector_store %arg8[%c0_59, %c0_60, %c0_61], %89 {strides = array<i32>} : memref<1x16x256xf32, #tpu.memory_space<vmem>>, vector<1x16x256xf32>,
    return
  }
  func.func @transform_0(%arg0: i32) -> (i32, i32, i32) {
    %c0_i32 = arith.constant 0 : i32
    %c0_i32_0 = arith.constant 0 : i32
    %c0_i32_1 = arith.constant 0 : i32
    return %arg0, %c0_i32, %c0_i32_0 : i32, i32, i32
  }
  func.func @transform_1(%arg0: i32) -> (i32, i32) {
    %c0_i32 = arith.constant 0 : i32
    %c0_i32_0 = arith.constant 0 : i32
    %c0_i32_1 = arith.constant 0 : i32
    return %c0_i32, %c0_i32_0 : i32, i32
  }
  func.func @transform_2(%arg0: i32) -> (i32, i32) {
    %c0_i32 = arith.constant 0 : i32
    %c0_i32_0 = arith.constant 0 : i32
    %c0_i32_1 = arith.constant 0 : i32
    return %c0_i32, %c0_i32_0 : i32, i32
  }
  func.func @transform_3(%arg0: i32) -> (i32, i32) {
    %c0_i32 = arith.constant 0 : i32
    %c0_i32_0 = arith.constant 0 : i32
    %c0_i32_1 = arith.constant 0 : i32
    return %c0_i32, %c0_i32_0 : i32, i32
  }
  func.func @transform_4(%arg0: i32) -> (i32, i32) {
    %c0_i32 = arith.constant 0 : i32
    %c0_i32_0 = arith.constant 0 : i32
    %c0_i32_1 = arith.constant 0 : i32
    return %c0_i32, %c0_i32_0 : i32, i32
  }
  func.func @transform_5(%arg0: i32) -> (i32, i32) {
    %c0_i32 = arith.constant 0 : i32
    %c0_i32_0 = arith.constant 0 : i32
    %c0_i32_1 = arith.constant 0 : i32
    return %c0_i32, %c0_i32_0 : i32, i32
  }
  func.func @transform_6(%arg0: i32) -> (i32, i32) {
    %c0_i32 = arith.constant 0 : i32
    %c0_i32_0 = arith.constant 0 : i32
    %c0_i32_1 = arith.constant 0 : i32
    return %c0_i32, %c0_i32_0 : i32, i32
  }
  func.func @transform_7(%arg0: i32) -> (i32, i32, i32) {
    %c0_i32 = arith.constant 0 : i32
    %c0_i32_0 = arith.constant 0 : i32
    %c0_i32_1 = arith.constant 0 : i32
    return %arg0, %c0_i32, %c0_i32_0 : i32, i32, i32
  }
}

</mosaic_0001>

<bundles_post_ra>
// kernel: tpu_custom_call.1
= control target key start
LH: loop header
LB: loop body
LE: loop exit
PB: predicated region body
PF: predicated region fallthrough
CT: control target
= control target key end

     0   :  { %12 = vsyncpa [#allocation5], 0  ;;  %s1427_s0 = inlined_call_operand.hbm [shape: f32[2,16,256], index: 0, kind: input, shape index: {}]   ;;  %s1428_s1 = inlined_call_operand.vmem [shape: f32[4,16], index: 1, kind: input, shape index: {}]   ;;  %s1429_s2 = inlined_call_operand.vmem [shape: f32[4,1], index: 2, kind: input, shape index: {}]   ;;  %s1430_s3 = inlined_call_operand.vmem [shape: f32[4,36], index: 3, kind: input, shape index: {}]   ;;  %s1431_s4 = inlined_call_operand.vmem [shape: f32[4,1], index: 4, kind: input, shape index: {}]   ;;  %s1432_s5 = inlined_call_operand.vmem [shape: f32[16,4], index: 5, kind: input, shape index: {}]   ;;  %s1433_s6 = inlined_call_operand.vmem [shape: f32[16,1], index: 6, kind: input, shape index: {}]   ;;  %s1434_s7 = inlined_call_operand.hbm [shape: f32[2,16,256], index: 7, kind: output, shape index: {}]  }
   0x1   :  { %14 = vsyncpa [#allocation5 + $0x1], 0 }
   0x2   :  { %15 = vsyncpa [#allocation6], 0 }
   0x3   :  { %17 = vsyncpa [#allocation6 + $0x1], 0  ;;  %s1142_s24 = smov 0   ;;  %s1144_s25 = smov 0  }
   0x4   :  { %s1146_s26 = smov 0   ;;  %s1148_s27 = smov 0  }
   0x5 LB: > { %s1163_s28 = sadd.s32 4294967295, %s1085_s27   ;;  %s902_s29 = sadd.s32 4294967294, %s1085_s27   ;;  %s1085_s27 = sphi %s1148_s27, %s1457_s27   ;;  %s1081_s26 = sphi %s1146_s26, %s1456_s26   ;;  %s1077_s25 = sphi %s1144_s25, %s1455_s25   ;;  %s1073_s24 = sphi %s1142_s24, %s1454_s24  }
   0x6   : > { %s1167_s30 = sadd.s32 1, %s1085_s27   ;;  %s30_s8 = sadd.s32 1, %s1081_s26 }
   0x7   : > { %s27_s9 = ssub.s32 %s1085_s27, %s1167_s30  ;;  %p37_p0 = scmp.ne.s32.totalorder %s1081_s26, %s1077_s25 }
   0x8   : > { %p28_p1 = scmp.eq.s32.totalorder %s27_s9, 0  ;;  %p38_p2 = scmp.eq.s32.totalorder %s1085_s27, 0 }
   0x9   : > { %p43_p3 = scmp.ne.s32.totalorder %s1077_s25, %s1073_s24  ;;  %p44_p4 = scmp.eq.s32.totalorder %s1163_s28, 0 }
   0xa   : > { %s1179_s10 = scalar_select %p28_p1, %s1081_s26, %s30_s8  }
   0xb   : > { %p1181_p5 = por %p38_p2, %p37_p0  ;;  %p1185_p6 = por %p44_p4, %p43_p3 }
   0xc   : > { %p193_p7 = scmp.eq.s32.totalorder %s1163_s28, 1  ;;  %p199_p8 = scmp.eq.s32.totalorder %s902_s29, 1 }
   0xd   : > { %s1438_s12 = scalar_select %p1185_p6, 1, 0 }
   0xe   : > { %p938_p10 = scmp.lt.s32.totalorder %s1085_s27, 2  ;;  %p1192_p11 = por %p193_p7, %p37_p0 }
   0xf   : > { %p1196_p12 = por %p199_p8, %p43_p3  ;;  %s237_s15 = sand.u32 1, %s1081_s26  }
  0x10   : > { %s1439_s13 = scalar_select %p1192_p11, 1, 0 }
  0x11   : > { %s1440_s14 = scalar_select %p1196_p12, 1, 0 }
  0x12   : > { %s924_s16 = sshll.u32 %s1085_s27, 9  ;;  %s905_s17 = sshll.u32 %s237_s15, 5 }
  0x13   : > { %s1205_s20 = scalar_lea.hbm %s1427_s0, %s924_s16  ;;  %s241_s21 = scalar_lea.vmem [#allocation4], %s905_s17 }
  0x14   : > { %s248_s22 = sshll.u32 %s241_s21, 4  ;;  %p1209_p13 = pnand %p938_p10, %p1181_p5  ;;  %s1213_s22 = int_to_ptr.vmem [resolvable:$true] %s248_s22 }
  0x15   : > { %s1215_s29 = scalar_lea.sflag [#allocation5], %s237_s15  ;;  %s993_s8 = scalar_lea.hbm %s1205_s20, 512 }
  0x16   : > { %p994_p0 = scmp.ne.s32.totalorder %s1205_s20, %s993_s8  ;;  %p995_p1 = pneg %p1209_p13 }
  0x17   : > { %s998_s17 = scalar_lea.hbm %s1427_s0, 1024  ;;  %p999_p4 = scmp.lt.s32.totalorder %s1205_s20, %s1427_s0 }
  0x18   : > { %p996_p2 = pnand %p995_p1, %p994_p0  ;;  %p1000_p5 = scmp.lt.s32.totalorder %s998_s17, %s993_s8 }
  0x1a   : > { %p997_p3 = pneg %p996_p2  ;;  %p1001_p7 = por %p1000_p5, %p999_p4 }
  0x1c   : > { %p1002_p8 = pnand %p1001_p7, %p997_p3 }
  0x1e   : > { %1005 = shalt.err (!%p1002_p8)
}
  0x1f   : > { %s1006_s15 = scalar_lea.vmem %s1213_s22, 512  ;;  %s1087_s19 = smov [#allocation4]  }
  0x20   : > { %p1007_p10 = scmp.ne.s32.totalorder %s1213_s22, %s1006_s15  ;;  %s1011_s21 = sshll.u32 %s1087_s19, 4  ;;  %s1012_s21 = int_to_ptr.vmem [resolvable:$false] %s1011_s21 }
  0x21   : > { %s1013_s9 = scalar_lea.vmem %s1012_s21, 1024  ;;  %p1014_p2 = scmp.lt.s32.totalorder %s1213_s22, %s1012_s21 }
  0x22   : > { %p1009_p9 = pnand %p1007_p10, %p995_p1  ;;  %p1015_p12 = scmp.lt.s32.totalorder %s1013_s9, %s1006_s15 }
  0x24   : > { %p1010_p0 = pneg %p1009_p9  ;;  %p1016_p11 = por %p1015_p12, %p1014_p2 }
  0x26   : > { %p1017_p6 = pnand %p1016_p11, %p1010_p0 }
  0x28   : > { %1020 = shalt.err (!%p1017_p6)
}
  0x29   : > { %s1088_s8 = smov 256   ;;  %s1089_s16 = smov 16  }
  0x2a   : > { %933 = dma.hbm_to_vmem [thread:$0]  (!%p1209_p13), %s1205_s20, 512, %s1213_s22, %s1215_s29, %s1088_s8, %s1088_s8, %s1089_s16  }
  0x2b   : > { %p908_p9 = scmp.ge.s32.totalorder %s1085_s27, 1  ;;  %p256_p1 = scmp.lt.s32.totalorder %s1085_s27, 3 }
  0x2d   : > { %p257_p3 = pnand %p908_p9, %p256_p1 }
  0x2e   : > { %s1239_s17 = sand.u32 (!%p257_p3), 1, %s1077_s25   ;;  %p1442_p6 = scmp.ne.s32.totalorder (!%p257_p3), %s1438_s12, 0 }
  0x2f   : > { %260 = sbr.rel (%p257_p3) target bundleno = 850 (0x352), region = 48  ;;  %s909_s11 = sshll.u32 (!%p257_p3), %s1239_s17, 5 }
  0x30   : > { %s263_s18 = scalar_lea.sflag (!%p257_p3), [#allocation5], %s1239_s17  ;;  %s266_s15 = scalar_lea.vmem (!%p257_p3), [#allocation4], %s909_s11 }
  0x34   : > { %1064 = dma.done.wait (%p1442_p6), %s263_s18, 512  }
  0x35   : > { %1066 = vsyncadd (%p1442_p6), %s263_s18, 4294966784  ;;  %v1090_v0 = vmov 0.0   ;;  %v1091_v1 = vmov 0   ;;  %v1253_v2 = vld [vmem:[%s266_s15 + $0x18] sm:$0xff]  ;;  %v1255_v3 = vld [vmem:[%s266_s15 + $0x10] sm:$0xff]  ;;  %vm308_vm0 = vcmask 130048   ;;  %v392_v38 = vlaneseq }
  0x36   : > { %376 = vmatprep.mubr.f32.mxu0 %v1090_v0  ;;  %386 = vst [vmem:[#allocation2 + $0x8] sm:$0xff] %v1090_v0  ;;  %385 = vst [vmem:[#allocation2] sm:$0xff] %v1090_v0  ;;  %985 = vset.pattern.permute.xlu0 %v1091_v1  ;;  %v1257_v4 = vld [vmem:[%s266_s15 + $0x8] sm:$0xff]  ;;  %v1260_v5 = vld [vmem:[%s266_s15] sm:$0xff]  ;;  %s1092_s29 = smov 111   ;;  %s1093_s19 = smov 127  }
  0x37   : > { %690 = vmatprep.mubr.f32.mxu1 %v1090_v0  ;;  %986 = vset.pattern.permute.xlu1 %v1091_v1  ;;  %v302_v6 = vld [vmem:[%s1429_s2] sm:$0xf]  ;;  %s1094_s21 = smov 113   ;;  %s1095_s9 = smov 112   ;;  %v702_v31 = vld [vmem:[%s1433_s6 + $0x8] sm:$0xff]  ;;  %vm571_vm1 = vcmask 916480  }
  0x38   : > { %340 = vmatprep.subr.mxu0 %v1253_v2  ;;  %v301_v7 = vld [vmem:[%s1428_s1] sm:$0xf]  ;;  %305 = vperm.xlu0 %985, %v302_v6   ;;  %s1096_s8 = smov 1   ;;  %s1097_s16 = smov 15   ;;  %v393_v42 = vand.u32 127, %v392_v38  ;;  %vm589_vm2 = vcmask 908288  }
  0x39   : > { %341 = vmatpush1.msra.mxu0 %v1255_v3  ;;  %s1098_s18 = smov 17   ;;  %s1099_s15 = smov 16   ;;  %v609_v29 = vld [vmem:[%s1431_s4] sm:$0xf]  ;;  %vm524_vm5 = vcmask 1039360   ;;  %vm432_vm6 = vcmask 138240  }
  0x3a   : > { %342 = vmatprep.subr.mxu0 %v1257_v4  ;;  %v701_v30 = vld [vmem:[%s1433_s6] sm:$0xff]  ;;  %v394_v45 = vadd.s32 128, %v393_v42  ;;  %v399_v48 = vand.u32 15, %v393_v42  ;;  %vm550_vm9 = vcmask 924672   ;;  %vm619_vm10 = vcmask 1043456   ;;  %s296_s20 = scalar_lea.vmem [#allocation7], %s909_s11 }
  0x3b   : > { %343 = vmatpush1.msra.mxu0 %v1260_v5  ;;  %vm492_vm11 = vcmask 7168   ;;  %vm472_vm12 = vcmask 121856   ;;  %vm615_vm13 = vcmask 293888   ;;  %vm713_vm14 = vcmask 31744   ;;  %s829_s22 = sshll.u32 %s296_s20, 4  ;;  %s925_s23 = sshll.u32 %s1163_s28, 9  ;;  %s1378_s22 = int_to_ptr.vmem [resolvable:$true] %s829_s22 }
  0x3c   : > { %911 = vmatmul.mubr.msk.f32.vlgmr.msra.gmra.mxu0 %vm308_vm0, %v301_v7  ;;  %v406_v49 = vand.u32 15, %v394_v45  ;;  %vm1307_vm3 = vcmp.le.s32.totalorder %v399_v48, 14  ;;  %vm1319_vm7 = vcmp.ge.s32.totalorder %v399_v48, 1  ;;  %p1451_p12 = scmp.ne.s32.totalorder %s1439_s13, 0  ;;  %s1100_s28 = smov [#allocation7]  }
  0x3d   : > { %790 = vmatprep.mubr.f32.mxu0 %v1090_v0  ;;  %v579_v8 = vld [vmem:[#allocation2 + $0xc] sm:$0xf] }
  0x3e   : > { %587 = vrot.lane.b32.xlu1 %v579_v8, %s1092_s29  ;;  %v514_v9 = vld [vmem:[#allocation2 + $0xc] sm:$0xf]  ;;  %vm1311_vm4 = vcmp.le.s32.totalorder %v406_v49, 14  ;;  %vm1323_vm8 = vcmp.ge.s32.totalorder %v406_v49, 1 }
  0x3f   : > { %v540_v10 = vld [vmem:[#allocation2 + $0xc] sm:$0xf] }
  0x40   : > { %v987_v11 = vld [vmem:[#allocation2 + $0xc] ss:$0 sps:$4 sm:$0xff]  }
  0x42   : > { %522 = vrot.lane.b32.xlu1 %v514_v9, %s1093_s19 }
  0x46   : > { %548 = vrot.lane.b32.xlu1 %v540_v10, %s1094_s21 }
  0x4a   : > { %569 = vrot.lane.b32.xlu1 %v987_v11, %s1095_s9 }
  0xb0   : > { %v588_v32 = vpop.permute.xlu1 %587 }
  0xb3   : > { %v306_v12 = vpop.permute.xlu0 %305 }
  0xb4   : > { %v523_v33 = vpop.permute.xlu1 %522 }
  0xb8   : > { %v549_v34 = vpop.permute.xlu1 %548 }
  0xbc   : > { %v570_v35 = vpop.permute.xlu1 %569 }
  0xfc   : > { %v378_v13 = vpop.f32.mrf.mxu0 }
  0xfd   : > { %v379_v14 = vadd.f32 %v378_v13, %v306_v12 }
  0xfe   : > { %v380_v15 = vpop.f32.mrf.mxu0 }
  0xff   : > { %v381_v16 = vadd.f32 %v380_v15, %v306_v12  ;;  %v383_v17 = vmax.f32 %v379_v14, 0.0 }
 0x101   : > { %v384_v18 = vmax.f32 %v381_v16, 0.0  ;;  %v992_v27 = vcombine.low %v383_v17, %v383_v17 }
 0x103   : > { %v389_v19 = vcombine.low %v383_v17, %v384_v18  ;;  %v991_v20 = vcombine.low %v384_v18, %v384_v18 }
 0x105   : > { %391 = vst [vmem:[#allocation2 + $0x4] sm:$0xff] %v389_v19  ;;  %583 = vrot.lane.b32.xlu1 %v389_v19, %s1092_s29  ;;  %518 = vrot.lane.b32.xlu0 %v389_v19, %s1093_s19  ;;  %511 = vst [vmem:[#allocation3 + $0x48] sm:$0xf] %v389_v19 }
 0x106   : > { %512 = vst [vmem:[#allocation3 + $0x28] sm:$0xf] %v991_v20 }
 0x109   : > { %544 = vrot.lane.b32.xlu1 %v389_v19, %s1094_s21  ;;  %567 = vrot.lane.b32.xlu0 %v389_v19, %s1095_s9 }
 0x10c   : > { %v482_v21 = vld [vmem:[#allocation2 + $0x8] sm:$0xf]  ;;  %v459_v22 = vld [vmem:[#allocation2] sm:$0xff] }
 0x10d   : > { %490 = vrot.lane.b32.xlu1 %v482_v21, %s1096_s8  ;;  %466 = vrot.lane.b32.xlu0 %v459_v22, %s1097_s16  ;;  %v420_v23 = vld [vmem:[#allocation2 + $0x8] sm:$0xf]  ;;  %v465_v25 = vcombine.high %v459_v22, %v459_v22  ;;  %v445_v28 = vcombine.low %v459_v22, %v459_v22 }
 0x10e   : > { %v460_v24 = vld [vmem:[#allocation2 + $0x8] sm:$0xf] }
 0x10f   : > { %v990_v26 = vld [vmem:[#allocation2 + $0x8] ss:$0 sps:$4 sm:$0xff]  }
 0x111   : > { %486 = vrot.lane.b32.xlu1 %v459_v22, %s1096_s8  ;;  %430 = vrot.lane.b32.xlu0 %v420_v23, %s1098_s18 }
 0x115   : > { %470 = vrot.lane.b32.xlu1 %v460_v24, %s1097_s16  ;;  %449 = vrot.lane.b32.xlu0 %v459_v22, %s1099_s15 }
 0x119   : > { %585 = vrot.lane.b32.xlu0 %v991_v20, %s1092_s29  ;;  %426 = vrot.lane.b32.xlu1 %v459_v22, %s1098_s18 }
 0x11d   : > { %520 = vrot.lane.b32.xlu0 %v991_v20, %s1093_s19  ;;  %428 = vrot.lane.b32.xlu1 %v465_v25, %s1098_s18  ;;  %s1383_s19 = scalar_lea.hbm %s1434_s7, %s925_s23 }
 0x121   : > { %546 = vrot.lane.b32.xlu0 %v991_v20, %s1094_s21  ;;  %451 = vrot.lane.b32.xlu1 %v990_v26, %s1099_s15  ;;  %s816_s21 = scalar_lea.sflag [#allocation6], %s1239_s17 }
 0x125   : > { %488 = vrot.lane.b32.xlu0 %v465_v25, %s1096_s8  ;;  %612 = vperm.xlu1 %986, %v609_v29   ;;  %s1025_s8 = sshll.u32 %s1100_s28, 4  ;;  %s1026_s8 = int_to_ptr.vmem [resolvable:$false] %s1025_s8 }
 0x126   : > { %p1028_p5 = scmp.lt.s32.totalorder %s1378_s22, %s1026_s8 }
 0x129   : > { %565 = vrot.lane.b32.xlu0 %v992_v27, %s1095_s9  ;;  %710 = vperm.xlu1 %986, %v702_v31   ;;  %s1021_s9 = scalar_lea.vmem %s1378_s22, 512 }
 0x12a   : > { %p1022_p11 = scmp.ne.s32.totalorder %s1378_s22, %s1021_s9 }
 0x12c   : > { %p1023_p13 = pnand %p1022_p11, %p1451_p12 }
 0x12d   : > { %468 = vrot.lane.b32.xlu0 %v465_v25, %s1097_s16  ;;  %s1027_s16 = scalar_lea.vmem %s1026_s8, 1024 }
 0x12e   : > { %p1024_p4 = pneg %p1023_p13  ;;  %p1029_p7 = scmp.lt.s32.totalorder %s1027_s16, %s1021_s9 }
 0x130   : > { %p1030_p8 = por %p1029_p7, %p1028_p5 }
 0x131   : > { %447 = vrot.lane.b32.xlu0 %v445_v28, %s1099_s15 }
 0x132   : > { %p1031_p10 = pnand %p1030_p8, %p1024_p4 }
 0x135   : > { %705 = vperm.xlu0 %985, %v701_v30  }
 0x177   : > { %v584_v36 = vpop.permute.xlu1 %583  ;;  %v519_v37 = vpop.permute.xlu0 %518 }
 0x17b   : > { %v545_v39 = vpop.permute.xlu1 %544  ;;  %v1297_v40 = vpop.permute.xlu0 %567 }
 0x17c   : > { %v573_v41 = vsel %vm571_vm1, %v1297_v40, %v570_v35 }
 0x17d   : > { %577 = vst [vmem:[#allocation3 + $0x20] sm:$0xf0] %v573_v41 }
 0x17f   : > { %v491_v43 = vpop.permute.xlu1 %490  ;;  %v1301_v44 = vpop.permute.xlu0 %466 }
 0x183   : > { %v487_v46 = vpop.permute.xlu1 %486  ;;  %v431_v47 = vpop.permute.xlu0 %430 }
 0x187   : > { %v1303_v50 = vpop.permute.xlu1 %470  ;;  %v1305_v51 = vpop.permute.xlu0 %449 }
 0x18b   : > { %v586_v54 = vpop.permute.xlu0 %585  ;;  %v427_v55 = vpop.permute.xlu1 %426 }
 0x18c   : > { %v590_v56 = vsel %vm589_vm2, %v584_v36, %v586_v54  ;;  %v591_v57 = vsel %vm589_vm2, %v586_v54, %v588_v32 }
 0x18d   : > { %v594_v58 = vsel %vm1307_vm3, %v590_v56, 0.0  ;;  %v595_v59 = vsel %vm1311_vm4, %v591_v57, 0.0  ;;  %v699_v56 = vld [vmem:[%s1432_s5] sm:$0xff]  ;;  %v700_v57 = vld [vmem:[%s1432_s5 + $0x8] sm:$0xff] }
 0x18e   : > { %596 = vst [vmem:[#allocation3 + $0x40] sm:$0xf] %v594_v58  ;;  %597 = vst [vmem:[#allocation3 + $0x38] sm:$0xf] %v595_v59 }
 0x18f   : > { %v521_v62 = vpop.permute.xlu0 %520  ;;  %v429_v63 = vpop.permute.xlu1 %428 }
 0x190   : > { %v525_v1 = vsel %vm524_vm5, %v519_v37, %v521_v62  ;;  %v526_v6 = vsel %vm524_vm5, %v521_v62, %v523_v33  ;;  %v433_v7 = vsel %vm432_vm6, %v427_v55, %v429_v63  ;;  %v434_v8 = vsel %vm432_vm6, %v429_v63, %v431_v47  ;;  %v598_v47 = vld [vmem:[%s1430_s3] sm:$0xf] }
 0x191   : > { %v529_v9 = vsel %vm1307_vm3, %v525_v1, 0.0  ;;  %v530_v10 = vsel %vm1311_vm4, %v526_v6, 0.0  ;;  %v437_v11 = vsel %vm1319_vm7, %v433_v7, 0.0  ;;  %v438_v12 = vsel %vm1323_vm8, %v434_v8, 0.0 }
 0x192   : > { %v533_v13 = vrot.slane %v529_v9, 4  ;;  %v534_v14 = vrot.slane %v530_v10, 4  ;;  %439 = vst [vmem:[#allocation3 + $0x30] sm:$0xf] %v437_v11  ;;  %440 = vst [vmem:[#allocation3] sm:$0xf] %v438_v12 }
 0x193   : > { %v547_v15 = vpop.permute.xlu0 %546  ;;  %v452_v16 = vpop.permute.xlu1 %451 }
 0x194   : > { %537 = vst [vmem:[#allocation3 + $0x48] sm:$0xf0] %v533_v13  ;;  %538 = vst [vmem:[#allocation3 + $0x28] sm:$0xf0] %v534_v14  ;;  %v551_v17 = vsel %vm550_vm9, %v545_v39, %v547_v15  ;;  %v552_v18 = vsel %vm550_vm9, %v547_v15, %v549_v34  ;;  %v454_v19 = vsel %vm308_vm0, %v1305_v51, %v452_v16 }
 0x195   : > { %v555_v20 = vsel %vm1319_vm7, %v551_v17, 0.0  ;;  %v556_v21 = vsel %vm1323_vm8, %v552_v18, 0.0  ;;  %458 = vst [vmem:[#allocation3] sm:$0xf0] %v454_v19  ;;  %v608_v22 = vld [vmem:[#allocation3 + $0x38] sm:$0xf] }
 0x196   : > { %v607_v23 = vld [vmem:[#allocation3 + $0x40] sm:$0xf]  ;;  %557 = vst [vmem:[#allocation3 + $0x8] sm:$0xf] %v555_v20  ;;  %558 = vst [vmem:[#allocation3 + $0x20] sm:$0xf] %v556_v21  ;;  %912 = vmatprep.subr.msk.mxu1 %vm619_vm10, %v608_v22 }
 0x197   : > { %913 = vmatpush1.msk.msra.mxu1 %vm619_vm10, %v607_v23  ;;  %v489_v24 = vpop.permute.xlu0 %488 }
 0x198   : > { %v493_v25 = vsel %vm492_vm11, %v487_v46, %v489_v24  ;;  %v494_v26 = vsel %vm492_vm11, %v489_v24, %v491_v43 }
 0x199   : > { %v497_v27 = vsel %vm1319_vm7, %v493_v25, 0.0  ;;  %v498_v28 = vsel %vm1323_vm8, %v494_v26, 0.0 }
 0x19a   : > { %v501_v29 = vrot.slane %v497_v27, 4  ;;  %v502_v30 = vrot.slane %v498_v28, 4 }
 0x19b   : > { %v566_v31 = vpop.permute.xlu0 %565  ;;  %v604_v42 = vld [vmem:[#allocation3 + $0x28] sm:$0xff] }
 0x19c   : > { %505 = vst [vmem:[#allocation3 + $0x18] sm:$0xf0] %v501_v29  ;;  %506 = vst [vmem:[#allocation3 + $0x10] sm:$0xf0] %v502_v30  ;;  %v572_v32 = vsel %vm571_vm1, %v566_v31, %v1297_v40  ;;  %v603_v43 = vld [vmem:[#allocation3 + $0x48] sm:$0xff]  ;;  %v600_v46 = vld [vmem:[#allocation3] sm:$0xff] }
 0x19d   : > { %576 = vst [vmem:[#allocation3 + $0x8] sm:$0xf0] %v572_v32  ;;  %v606_v33 = vld [vmem:[#allocation3 + $0x20] sm:$0xff] }
 0x19e   : > { %650 = vmatprep.subr.mxu1 %v606_v33 }
 0x19f   : > { %v469_v34 = vpop.permute.xlu0 %468 }
 0x1a0   : > { %v473_v35 = vsel %vm472_vm12, %v1301_v44, %v469_v34  ;;  %v474_v36 = vsel %vm472_vm12, %v469_v34, %v1303_v50  ;;  %v613_v50 = vpop.permute.xlu1 %612 }
 0x1a1   : > { %v477_v37 = vsel %vm1307_vm3, %v473_v35, 0.0  ;;  %v478_v38 = vsel %vm1311_vm4, %v474_v36, 0.0 }
 0x1a2   : > { %479 = vst [vmem:[#allocation3 + $0x18] sm:$0xf] %v477_v37  ;;  %480 = vst [vmem:[#allocation3 + $0x10] sm:$0xf] %v478_v38 }
 0x1a3   : > { %v448_v39 = vpop.permute.xlu0 %447 }
 0x1a4   : > { %v453_v40 = vsel %vm308_vm0, %v448_v39, %v1305_v51  ;;  %v605_v41 = vld [vmem:[#allocation3 + $0x8] sm:$0xff]  ;;  %v711_v1 = vpop.permute.xlu1 %710 }
 0x1a5   : > { %457 = vst [vmem:[#allocation3 + $0x30] sm:$0xf0] %v453_v40  ;;  %651 = vmatpush1.msra.mxu1 %v605_v41 }
 0x1a6   : > { %652 = vmatprep.subr.mxu1 %v604_v42 }
 0x1a7   : > { %653 = vmatpush1.msra.mxu1 %v603_v43 }
 0x1a9   : > { %v602_v44 = vld [vmem:[#allocation3 + $0x10] sm:$0xff]  ;;  %v601_v45 = vld [vmem:[#allocation3 + $0x18] sm:$0xff] }
 0x1aa   : > { %654 = vmatprep.subr.mxu1 %v602_v44 }
 0x1ab   : > { %655 = vmatpush1.msra.mxu1 %v601_v45 }
 0x1ac   : > { %656 = vmatprep.subr.mxu1 %v600_v46  ;;  %v599_v48 = vld [vmem:[#allocation3 + $0x30] sm:$0xff] }
 0x1ad   : > { %657 = vmatpush1.msra.mxu1 %v599_v48 }
 0x1ae   : > { %914 = vmatmul.mubr.msk.f32.vlgmr.msra.gmra.mxu1 %vm615_vm13, %v598_v47 }
 0x1b0   : > { %v706_v58 = vpop.permute.xlu0 %705 }
 0x26e   : > { %v692_v49 = vpop.f32.mrf.mxu1 }
 0x26f   : > { %v693_v51 = vadd.f32 %v692_v49, %v613_v50 }
 0x270   : > { %v694_v52 = vpop.f32.mrf.mxu1 }
 0x271   : > { %v695_v53 = vadd.f32 %v694_v52, %v613_v50  ;;  %v697_v55 = vmax.f32 %v693_v51, 0.0 }
 0x273   : > { %v698_v54 = vmax.f32 %v695_v53, 0.0 }
 0x275   : > { %915 = vmatprep.subr.msk.mxu0 %vm619_vm10, %v698_v54 }
 0x276   : > { %916 = vmatpush1.msk.msra.mxu0 %vm619_vm10, %v697_v55 }
 0x277   : > { %917 = vmatmul.mubr.msk.f32.vlgmr.msra.gmra.mxu0 %vm713_vm14, %v699_v56 }
 0x278   : > { %796 = vmatprep.mubr.f32.mxu0 %v1090_v0 }
 0x27b   : > { %918 = vmatmul.mubr.msk.f32.gmra.mxu0 %vm713_vm14, %v700_v57 }
 0x337   : > { %v792_v59 = vpop.f32.mrf.mxu0 }
 0x338   : > { %v793_v60 = vadd.f32 %v792_v59, %v706_v58 }
 0x339   : > { %v794_v61 = vpop.f32.mrf.mxu0 }
 0x33a   : > { %v803_v62 = vadd.f32 %v793_v60, %v1260_v5  ;;  %v795_v63 = vadd.f32 %v794_v61, %v706_v58 }
 0x33b   : > { %v798_v6 = vpop.f32.mrf.mxu0 }
 0x33c   : > { %v807_v7 = vmax.f32 %v803_v62, 0.0  ;;  %v804_v8 = vadd.f32 %v795_v63, %v1257_v4  ;;  %v799_v9 = vadd.f32 %v798_v6, %v711_v1 }
 0x33d   : > { %v800_v0 = vpop.f32.mrf.mxu0 }
 0x33e   : > { %811 = vst [vmem:[%s296_s20] sm:$0xff] %v807_v7  ;;  %v808_v10 = vmax.f32 %v804_v8, 0.0  ;;  %v805_v11 = vadd.f32 %v799_v9, %v1255_v3  ;;  %v801_v12 = vadd.f32 %v800_v0, %v711_v1 }
 0x340   : > { %812 = vst [vmem:[%s296_s20 + $0x8] sm:$0xff] %v808_v10  ;;  %v809_v5 = vmax.f32 %v805_v11, 0.0  ;;  %v806_v13 = vadd.f32 %v801_v12, %v1253_v2 }
 0x342   : > { %813 = vst [vmem:[%s296_s20 + $0x10] sm:$0xff] %v809_v5  ;;  %v810_v4 = vmax.f32 %v806_v13, 0.0 }
 0x344   : > { %814 = vst [vmem:[%s296_s20 + $0x18] sm:$0xff] %v810_v4 }
 0x345   : > { %1034 = shalt.err (!%p1031_p10)
}
 0x346   : > { %s1035_s18 = scalar_lea.hbm %s1383_s19, 512  ;;  %s1039_s23 = scalar_lea.hbm %s1434_s7, 1024 }
 0x347   : > { %p1036_p0 = scmp.ne.s32.totalorder %s1383_s19, %s1035_s18  ;;  %p1040_p1 = scmp.lt.s32.totalorder %s1383_s19, %s1434_s7 }
 0x348   : > { %p1041_p3 = scmp.lt.s32.totalorder %s1039_s23, %s1035_s18 }
 0x349   : > { %p1037_p2 = pnand %p1036_p0, %p1451_p12 }
 0x34a   : > { %p1042_p6 = por %p1041_p3, %p1040_p1 }
 0x34b   : > { %p1038_p9 = pneg %p1037_p2 }
 0x34d   : > { %p1043_p11 = pnand %p1042_p6, %p1038_p9 }
 0x34f   : > { %1046 = shalt.err (!%p1043_p11)
}
 0x350   : > { %s1101_s9 = smov 256  }
 0x351   : > { %928 = dma.vmem_to_hbm [thread:$0]  (%p1451_p12), %s1378_s22, 512, %s1383_s19, %s816_s21, %s1101_s9, %s1101_s9, %s1099_s15  }
 0x352 PF: > { %s844_s28 = sand.u32 1, %s1073_s24   ;;  %p1452_p13 = scmp.ne.s32.totalorder %s1440_s14, 0 }
 0x353   : > { %p1453_p4 = scmp.ge.s32.totalorder %s1085_s27, 2  ;;  %s845_s8 = scalar_lea.sflag [#allocation6], %s844_s28 }
 0x355   : > { %p935_p5 = pnand %p1453_p4, %p1452_p13 }
 0x357   : > { %p936_p7 = pneg %p935_p5 }
 0x359   : > { %1068 = dma.done.wait (%p936_p7), %s845_s8, 512  }
 0x35a   : > { %1070 = vsyncadd (%p936_p7), %s845_s8, 4294966784  ;;  %p20_p8 = scmp.ge.s32.totalorder %s1167_s30, 4   ;;  %s1454_s24 = smov %s1077_s25 }
 0x35b   : > { %s1455_s25 = smov %s1081_s26  ;;  %s1456_s26 = smov %s1179_s10 }
 0x35c   : > { %s1457_s27 = smov %s1167_s30  ;;  %22 = sbr.rel (!%p20_p8) target bundleno = 5 (0x5), region = 93 }
 0x361   :  { %850 = vsyncpa [#allocation5], 1 }
 0x362   :  { %852 = vsyncpa [#allocation5 + $0x1], 1 }
 0x363   :  { %853 = vsyncpa [#allocation6], 1 }
 0x364   :  { %855 = vsyncpa [#allocation6 + $0x1], 1 }

</bundles_post_ra>
